<compile_context>
chip_gen: v6e
topology: v6e:2x2x1
jax: 0.10.0
libtpu: 0.0.40
codegen_flags: <defaults>
</compile_context>

<pallas_src>
import functools

import jax
import jax.numpy as jnp
from jax.experimental import pallas as pl
from jax.experimental.pallas import tpu as pltpu

LANE = 128
SUBLANE = 8
SECTION_ALIGN = 16  # bf16 packs 16 rows per sublane group; keep sections aligned.


def _round_up(v, m):
    return (v + m - 1) // m * m


def _mlp_kernel(x_ref, p_ref, o_ref, *, offs, s_rows, width):
    """x_ref: (b_p, s_rows) f32; p_ref: (R, width) bf16 slab; o_ref: (b_p, width) f32."""
    off_w1, off_w2, off_w3, off_w4, off_b = offs

    # Compact bias block: b1..b4 are rows 0..3 of one packed section (1 vreg).
    bias = p_ref[off_b:off_b + 4, :]

    # Layer 1: Linear + ReLU  (bf16 x bf16 on the MXU, f32 accumulation)
    h = jnp.dot(x_ref[...].astype(jnp.bfloat16),
                p_ref[off_w1:off_w1 + s_rows, :],
                preferred_element_type=jnp.float32)
    h = jnp.maximum(h + bias[0:1, :], 0.0)

    # Layer 2: Linear + ReLU
    h = jnp.dot(h.astype(jnp.bfloat16),
                p_ref[off_w2:off_w2 + width, :],
                preferred_element_type=jnp.float32)
    h = jnp.maximum(h + bias[1:2, :], 0.0)

    # Layer 3: Linear + ReLU
    h = jnp.dot(h.astype(jnp.bfloat16),
                p_ref[off_w3:off_w3 + width, :],
                preferred_element_type=jnp.float32)
    h = jnp.maximum(h + bias[2:3, :], 0.0)

    # Layer 4: Linear (Q-values), full-lane (width % 128 == 0) store.
    q = jnp.dot(h.astype(jnp.bfloat16),
                p_ref[off_w4:off_w4 + width, :],
                preferred_element_type=jnp.float32)
    o_ref[...] = (q + bias[3:4, :]).astype(o_ref.dtype)


def pack_params(params):
    """Pack w1..w4 / b1..b4 into one zero-padded, lane-dense bf16 slab.

    Sections start at 16-row-aligned offsets (bf16 sublane-packing granularity)
    and the lane width is a multiple of 128, so every section (including the
    action-dim weights) is lane-dense.  Padded rows/cols are zero, which is
    semantics-preserving: padded hidden units get zero weight + zero bias, so
    ReLU keeps them at exactly 0 and they contribute nothing downstream.
    """
    state_size, hidden_size = params["w1"].shape
    action_size = params["w4"].shape[1]

    width = max(_round_up(hidden_size, LANE), _round_up(action_size, LANE))
    s_rows = _round_up(state_size, SECTION_ALIGN)

    off_w1 = 0
    off_w2 = off_w1 + s_rows
    off_w3 = off_w2 + width
    off_w4 = off_w3 + width
    off_b = off_w4 + width
    total_rows = off_b + SECTION_ALIGN

    slab = jnp.zeros((total_rows, width), jnp.float32)

    def put(s, off, arr):
        return s.at[off:off + arr.shape[0], :arr.shape[1]].set(arr)

    slab = put(slab, off_w1, params["w1"])
    slab = put(slab, off_w2, params["w2"])
    slab = put(slab, off_w3, params["w3"])
    slab = put(slab, off_w4, params["w4"])
    # b1..b4 compacted into consecutive rows of a single section.
    slab = put(slab, off_b + 0, params["b1"])
    slab = put(slab, off_b + 1, params["b2"])
    slab = put(slab, off_b + 2, params["b3"])
    slab = put(slab, off_b + 3, params["b4"])

    # MXU-native dtype; halves the per-call HBM->VMEM transfer.  Matmuls still
    # accumulate in f32 inside the kernel.
    slab = slab.astype(jnp.bfloat16)

    # VMEM ceiling guard: v7x has 64 MiB physical VMEM (v5e/v6e: 128 MiB); the
    # whole-slab-resident design stops scaling around hidden_size ~2K (bf16).
    # TODO(synk): above that, switch to a K/N-tiled grid with a resident f32
    # accumulator (P3) and raise vmem_limit_bytes instead of this assert.
    slab_bytes = slab.size * slab.dtype.itemsize
    assert slab_bytes < 48 * 1024 * 1024, (
        "param slab too large for whole-slab-resident kernel; tile it")

    return {
        "slab": slab,
        "offs": (off_w1, off_w2, off_w3, off_w4, off_b),
        "s_rows": s_rows,
        "width": width,
        "state_size": state_size,
        "action_size": action_size,
    }


def policy_network_dqn(x, packed, *, unpad=True):
    """Forward pass of PolicyNetworkDQN via one un-gridded Pallas call.

    x: (B, state_size) float32
    packed: output of pack_params(params)
    unpad: if False, return the padded lane-dense (b_p, width) block so the
           consumer can fold the [:, :action_size] slice into its own fetch.
    """
    B, S = x.shape
    s_rows = packed["s_rows"]
    width = packed["width"]
    b_p = _round_up(B, SUBLANE)

    # Skip the pad entirely when shapes are already aligned (common case);
    # otherwise a single jnp.pad that XLA can fuse.
    if b_p != B or s_rows != S:
        x = jnp.pad(x, ((0, b_p - B), (0, s_rows - S)))

    kernel = functools.partial(
        _mlp_kernel, offs=packed["offs"], s_rows=s_rows, width=width)

    # Un-gridded: whole operands resident in VMEM, single kernel invocation,
    # no pipeline machinery.  Fixed ~1 us launch/DMA/MXU-fill cost dominates at
    # small B, so batch as many states per call as the caller can supply.
    # TODO(synk): for large batches add a batch grid: grid=(b_p // TB,),
    #   x/out BlockSpec((TB, .), lambda i: (i, 0)), slab BlockSpec with a
    #   constant index_map (lambda i: (0, 0)) so weights stay VMEM-resident,
    #   and dimension_semantics=("parallel",) to use both v7x TensorCores.
    #   On v5e/v6e (1 TC) a grid at this size is pure per-step overhead.
    out = pl.pallas_call(
        kernel,
        out_shape=jax.ShapeDtypeStruct((b_p, width), jnp.float32),
        in_specs=[
            pl.BlockSpec(memory_space=pltpu.MemorySpace.VMEM),
            pl.BlockSpec(memory_space=pltpu.MemorySpace.VMEM),
        ],
        out_specs=pl.BlockSpec(memory_space=pltpu.MemorySpace.VMEM),
    )(x, packed["slab"])

    if unpad:
        return out[:B, :packed["action_size"]]
    return out


def init_params(key, state_size, hidden_size, action_size):
    """Deterministic init mimicking PyTorch nn.Linear default:
    U(-1/sqrt(fan_in), 1/sqrt(fan_in)). Weights stored transposed as (in, out)."""
    dims = [(state_size, hidden_size),
            (hidden_size, hidden_size),
            (hidden_size, hidden_size),
            (hidden_size, action_size)]
    params = {}
    for idx, (fan_in, fan_out) in enumerate(dims, start=1):
        key, kw, kb = jax.random.split(key, 3)
        bound = 1.0 / jnp.sqrt(float(fan_in))
        params[f"w{idx}"] = jax.random.uniform(
            kw, (fan_in, fan_out), jnp.float32, minval=-bound, maxval=bound)
        params[f"b{idx}"] = jax.random.uniform(
            kb, (1, fan_out), jnp.float32, minval=-bound, maxval=bound)
    return params


def reference_forward(x, params):
    prec = jax.lax.Precision.HIGHEST
    h = jnp.maximum(jnp.dot(x, params["w1"], precision=prec) + params["b1"], 0.0)
    h = jnp.maximum(jnp.dot(h, params["w2"], precision=prec) + params["b2"], 0.0)
    h = jnp.maximum(jnp.dot(h, params["w3"], precision=prec) + params["b3"], 0.0)
    return jnp.dot(h, params["w4"], precision=prec) + params["b4"]


if __name__ == "__main__":
    # PyTorch module default hidden_size=128 (lane-friendly).
    state_size, hidden_size, action_size = 16, 128, 4
    batch = 8  # aligned -> no wrapper-side padding ops

    key = jax.random.PRNGKey(0)
    key, kx = jax.random.split(key)
    x = jax.random.normal(kx, (batch, state_size), dtype=jnp.float32)
    params = init_params(key, state_size, hidden_size, action_size)

    packed = pack_params(params)

    q = policy_network_dqn(x, packed)
    jax.block_until_ready(q)

    # bf16 weights/activations with f32 accumulation vs. f32 HIGHEST reference:
    # expect ~1e-3..1e-2 absolute error on O(0.1-1) outputs.
    q_ref = reference_forward(x, params)
    assert q.shape == (batch, action_size)
    assert jnp.allclose(q, q_ref, atol=5e-2, rtol=5e-2)

    print("KERNEL_OK")
</pallas_src>

<mosaic_0001>
module attributes {stable_mosaic.version = 11 : i64} {
  func.func @_mlp_kernel(%arg0: memref<8x16xf32, #tpu.memory_space<vmem>>, %arg1: memref<416x128xbf16, #tpu.memory_space<vmem>>, %arg2: memref<8x128xf32, #tpu.memory_space<vmem>>) attributes {dimension_semantics = [], scalar_prefetch = 0 : i64, scratch_operands = 0 : i64, tpu.core_type = #tpu.core_type<tc>} {
    %c400 = arith.constant 400 : index
    %c0 = arith.constant 0 : index
    %0 = vector.load %arg1[%c400, %c0] : memref<416x128xbf16, #tpu.memory_space<vmem>>, vector<4x128xbf16>
    %c0_0 = arith.constant 0 : index
    %c0_1 = arith.constant 0 : index
    %1 = vector.load %arg0[%c0_0, %c0_1] : memref<8x16xf32, #tpu.memory_space<vmem>>, vector<8x16xf32>
    %2 = arith.truncf %1 : vector<8x16xf32> to vector<8x16xbf16>
    %c0_2 = arith.constant 0 : index
    %c0_3 = arith.constant 0 : index
    %3 = vector.load %arg1[%c0_2, %c0_3] : memref<416x128xbf16, #tpu.memory_space<vmem>>, vector<16x128xbf16>
    %cst = arith.constant dense<0.000000e+00> : vector<8x128xf32>
    %4 = tpu.matmul %2, %3, %cst {dimension_numbers = #tpu.dot_dimension_numbers<[1], [0], [0], [1], [0, 0, 1, 1], [], []>} : vector<8x16xbf16>, vector<16x128xbf16>, vector<8x128xf32> -> vector<8x128xf32>
    %5 = vector.extract_strided_slice %0 {offsets = [0, 0], sizes = [1, 128], strides = [1, 1]} : vector<4x128xbf16> to vector<1x128xbf16>
    %6 = arith.extf %5 : vector<1x128xbf16> to vector<1x128xf32>
    %7 = vector.broadcast %6 : vector<1x128xf32> to vector<8x128xf32>
    %8 = arith.addf %4, %7 : vector<8x128xf32>
    %cst_4 = arith.constant 0.000000e+00 : f32
    %9 = vector.broadcast %cst_4 : f32 to vector<8x128xf32>
    %10 = arith.maximumf %8, %9 : vector<8x128xf32>
    %11 = arith.truncf %10 : vector<8x128xf32> to vector<8x128xbf16>
    %c16 = arith.constant 16 : index
    %c0_5 = arith.constant 0 : index
    %12 = vector.load %arg1[%c16, %c0_5] : memref<416x128xbf16, #tpu.memory_space<vmem>>, vector<128x128xbf16>
    %cst_6 = arith.constant dense<0.000000e+00> : vector<8x128xf32>
    %13 = tpu.matmul %11, %12, %cst_6 {dimension_numbers = #tpu.dot_dimension_numbers<[1], [0], [0], [1], [0, 0, 1, 1], [], []>} : vector<8x128xbf16>, vector<128x128xbf16>, vector<8x128xf32> -> vector<8x128xf32>
    %14 = vector.extract_strided_slice %0 {offsets = [1, 0], sizes = [1, 128], strides = [1, 1]} : vector<4x128xbf16> to vector<1x128xbf16>
    %15 = arith.extf %14 : vector<1x128xbf16> to vector<1x128xf32>
    %16 = vector.broadcast %15 : vector<1x128xf32> to vector<8x128xf32>
    %17 = arith.addf %13, %16 : vector<8x128xf32>
    %cst_7 = arith.constant 0.000000e+00 : f32
    %18 = vector.broadcast %cst_7 : f32 to vector<8x128xf32>
    %19 = arith.maximumf %17, %18 : vector<8x128xf32>
    %20 = arith.truncf %19 : vector<8x128xf32> to vector<8x128xbf16>
    %c144 = arith.constant 144 : index
    %c0_8 = arith.constant 0 : index
    %21 = vector.load %arg1[%c144, %c0_8] : memref<416x128xbf16, #tpu.memory_space<vmem>>, vector<128x128xbf16>
    %cst_9 = arith.constant dense<0.000000e+00> : vector<8x128xf32>
    %22 = tpu.matmul %20, %21, %cst_9 {dimension_numbers = #tpu.dot_dimension_numbers<[1], [0], [0], [1], [0, 0, 1, 1], [], []>} : vector<8x128xbf16>, vector<128x128xbf16>, vector<8x128xf32> -> vector<8x128xf32>
    %23 = vector.extract_strided_slice %0 {offsets = [2, 0], sizes = [1, 128], strides = [1, 1]} : vector<4x128xbf16> to vector<1x128xbf16>
    %24 = arith.extf %23 : vector<1x128xbf16> to vector<1x128xf32>
    %25 = vector.broadcast %24 : vector<1x128xf32> to vector<8x128xf32>
    %26 = arith.addf %22, %25 : vector<8x128xf32>
    %cst_10 = arith.constant 0.000000e+00 : f32
    %27 = vector.broadcast %cst_10 : f32 to vector<8x128xf32>
    %28 = arith.maximumf %26, %27 : vector<8x128xf32>
    %29 = arith.truncf %28 : vector<8x128xf32> to vector<8x128xbf16>
    %c272 = arith.constant 272 : index
    %c0_11 = arith.constant 0 : index
    %30 = vector.load %arg1[%c272, %c0_11] : memref<416x128xbf16, #tpu.memory_space<vmem>>, vector<128x128xbf16>
    %cst_12 = arith.constant dense<0.000000e+00> : vector<8x128xf32>
    %31 = tpu.matmul %29, %30, %cst_12 {dimension_numbers = #tpu.dot_dimension_numbers<[1], [0], [0], [1], [0, 0, 1, 1], [], []>} : vector<8x128xbf16>, vector<128x128xbf16>, vector<8x128xf32> -> vector<8x128xf32>
    %32 = vector.extract_strided_slice %0 {offsets = [3, 0], sizes = [1, 128], strides = [1, 1]} : vector<4x128xbf16> to vector<1x128xbf16>
    %33 = arith.extf %32 : vector<1x128xbf16> to vector<1x128xf32>
    %34 = vector.broadcast %33 : vector<1x128xf32> to vector<8x128xf32>
    %35 = arith.addf %31, %34 : vector<8x128xf32>
    %c0_13 = arith.constant 0 : index
    %c0_14 = arith.constant 0 : index
    %36 = vector.load %arg2[%c0_13, %c0_14] : memref<8x128xf32, #tpu.memory_space<vmem>>, vector<8x128xf32>
    tpu.vector_store %arg2[%c0_13, %c0_14], %35 {strides = array<i32>} : memref<8x128xf32, #tpu.memory_space<vmem>>, vector<8x128xf32>,
    return
  }
}

</mosaic_0001>

<bundles_post_ra>
// kernel: tpu_custom_call.1
= control target key start
LH: loop header
LB: loop body
LE: loop exit
PB: predicated region body
PF: predicated region fallthrough
CT: control target
= control target key end

     0   :  { %7 = vsyncpa [#allocation3], 0  ;;  %s735_s0 = inlined_call_operand.hbm [shape: f32[8,16], index: 0, kind: input, shape index: {}]   ;;  %s736_s1 = inlined_call_operand.hbm [shape: bf16[416,128], index: 1, kind: input, shape index: {}]   ;;  %s737_s2 = inlined_call_operand.hbm [shape: f32[8,128], index: 2, kind: output, shape index: {}]  }
   0x1   :  { %8 = vsyncpa [#allocation6], 0 }
   0x2   :  { %9 = vsyncpa [#allocation4], 0  ;;  %s665_s9 = smov [#allocation2]   ;;  %s666_s11 = smov [#allocation5]  }
   0x3   :  { %s16_s10 = sshll.u32 %s665_s9, 4  ;;  %s25_s12 = sshll.u32 %s666_s11, 4  ;;  %s17_s10 = int_to_ptr.vmem [resolvable:$true] %s16_s10  ;;  %s26_s12 = int_to_ptr.vmem [resolvable:$true] %s25_s12 }
   0x4   :  { %s607_s13 = scalar_lea.vmem %s17_s10, 128  ;;  %p612_p1 = scmp.lt.s32.totalorder %s17_s10, %s17_s10 }
   0x5   :  { %p608_p0 = scmp.ne.s32.totalorder %s17_s10, %s607_s13  ;;  %p613_p2 = scmp.lt.s32.totalorder %s607_s13, %s607_s13 }
   0x7   :  { %p614_p3 = por %p613_p2, %p612_p1 }
   0x9   :  { %p615_p4 = pnand %p614_p3, %p608_p0 }
   0xb   :  { %618 = shalt.err (!%p615_p4)
}
   0xc   :  { %19 = dma.hbm_to_vmem [thread:$0]  %s735_s0, 128, %s17_s10, [#allocation3]  }
   0xd   :  { %s627_s16 = scalar_lea.vmem %s26_s12, 3328  ;;  %p632_p6 = scmp.lt.s32.totalorder %s26_s12, %s26_s12 }
   0xe   :  { %p628_p5 = scmp.ne.s32.totalorder %s26_s12, %s627_s16  ;;  %p633_p7 = scmp.lt.s32.totalorder %s627_s16, %s627_s16 }
  0x10   :  { %p634_p8 = por %p633_p7, %p632_p6 }
  0x12   :  { %p635_p9 = pnand %p634_p8, %p628_p5 }
  0x14   :  { %638 = shalt.err (!%p635_p9)
}
  0x15   :  { %s667_s17 = smov 64   ;;  %s668_s18 = smov 4  }
  0x16   :  { %31 = dma.hbm_to_vmem [thread:$0]  %s736_s1, 3328, %s26_s12, [#allocation6], %s667_s17, %s667_s17, %s668_s18  }
  0x17   :  { %659 = dma.done.wait [#allocation3], 128  }
  0x18   :  { %660 = vsyncadd [#allocation3], 4294967168 }
  0x19   :  { %661 = dma.done.wait [#allocation6], 3328  }
  0x1a   :  { %662 = vsyncadd [#allocation6], 4294963968  ;;  %v669_v0 = vmov 0.0   ;;  %vm670_vm0 = vmmov 0   ;;  %v574_v1 = vld [vmem:[#allocation5] sm:$0xff]   ;;  %v40_v2 = vld [vmem:[#allocation2] sm:$0xff]  ;;  %v45_v18 = vlaneseq }
  0x1b   :  { %501 = vmatprep.subr.bf16.mxu0 %v669_v0  ;;  %503 = vmatprep.mubr.msk.bf16.mxu0 %vm670_vm0, %v669_v0  ;;  %v41_v3 = vpack.c.bf16 %v40_v2, %v40_v2  ;;  %vm55_vm1 = vcmask 130048   ;;  %v575_v4 = vld [vmem:[#allocation5 + $0x40] sm:$0xff]   ;;  %v576_v5 = vld [vmem:[#allocation5 + $0x38] sm:$0xff]   ;;  %v577_v6 = vld [vmem:[#allocation5 + $0x30] sm:$0xff]   ;;  %s671_s0 = smov [#allocation7]  }
  0x1c   :  { %507 = vmatprep.subr.bf16.mxu1 %v669_v0  ;;  %523 = vmatprep.mubr.msk.bf16.mxu1 %vm670_vm0, %v669_v0  ;;  %v578_v7 = vld [vmem:[#allocation5 + $0x28] sm:$0xff]   ;;  %v579_v8 = vld [vmem:[#allocation5 + $0x20] sm:$0xff]   ;;  %v580_v9 = vld [vmem:[#allocation5 + $0x18] sm:$0xff]   ;;  %v716_v19 = vshrl.u32 %v45_v18, 7  ;;  %s436_s1 = sshll.u32 %s671_s0, 4  ;;  %s437_s1 = int_to_ptr.vmem [resolvable:$true] %s436_s1 }
  0x1d   :  { %502 = vmatpush3.bf16.msra.mxu0 %v574_v1  ;;  %508 = vmatpush3.bf16.msra.mxu1 %v575_v4  ;;  %v581_v10 = vld [vmem:[#allocation5 + $0x10] sm:$0xff]   ;;  %v582_v11 = vld [vmem:[#allocation5 + $0x8] sm:$0xff]   ;;  %v583_v12 = vld [vmem:[#allocation5 + $0x80] sm:$0xff]   ;;  %s639_s21 = scalar_lea.vmem %s437_s1, 128  ;;  %p644_p11 = scmp.lt.s32.totalorder %s437_s1, %s437_s1 }
  0x1e   :  { %527 = vmatprep.subr.bf16.mxu0 %v669_v0  ;;  %509 = vmatprep.subr.bf16.mxu1 %v669_v0  ;;  %v584_v13 = vld [vmem:[#allocation5 + $0x78] sm:$0xff]   ;;  %v585_v14 = vld [vmem:[#allocation5 + $0x70] sm:$0xff]   ;;  %v586_v15 = vld [vmem:[#allocation5 + $0x68] sm:$0xff]   ;;  %v47_v22 = vsub.s32 0, %v716_v19  ;;  %v119_v39 = vsub.s32 1, %v716_v19  ;;  %v229_v50 = vsub.s32 2, %v716_v19  ;;  %p640_p10 = scmp.ne.s32.totalorder %s437_s1, %s639_s21  ;;  %p645_p12 = scmp.lt.s32.totalorder %s639_s21, %s639_s21 }
  0x1f   :  { %v587_v16 = vld [vmem:[#allocation5 + $0x60] sm:$0xff]   ;;  %v588_v17 = vld [vmem:[#allocation5 + $0x58] sm:$0xff]   ;;  %v39_v20 = vld [vmem:[#allocation5 + $0xc8] sm:$0x3]  ;;  %v339_v59 = vsub.s32 3, %v716_v19 }
  0x20   :  { %504 = vmatmul.mubr.msk.bf16.vlgmr.msra.gmra.mxu0 %vm55_vm1, %v41_v3  ;;  %v44_v21 = vunpack.c.l.bf16 %v39_v20  ;;  %v589_v31 = vld [vmem:[#allocation5 + $0x50] sm:$0xff]   ;;  %v590_v32 = vld [vmem:[#allocation5 + $0x48] sm:$0xff]   ;;  %v591_v33 = vld [vmem:[#allocation5 + $0xc0] sm:$0xff]   ;;  %p646_p13 = por %p645_p12, %p644_p11 }
  0x21   :  { %543 = vmatprep.mubr.msk.bf16.mxu0 %vm670_vm0, %v669_v0  ;;  %510 = vmatpush3.bf16.msra.mxu1 %v576_v5  ;;  %v592_v34 = vld [vmem:[#allocation5 + $0xb8] sm:$0xff]   ;;  %v593_v35 = vld [vmem:[#allocation5 + $0xb0] sm:$0xff]   ;;  %v594_v36 = vld [vmem:[#allocation5 + $0xa8] sm:$0xff]  }
  0x22   :  { %511 = vmatprep.subr.bf16.mxu1 %v669_v0  ;;  %528 = vmatpush3.bf16.msra.mxu0 %v583_v12  ;;  %v48_v23 = vrot.slane %v44_v21, %v47_v22  ;;  %v595_v37 = vld [vmem:[#allocation5 + $0xa0] sm:$0xff]   ;;  %v596_v38 = vld [vmem:[#allocation5 + $0x98] sm:$0xff]   ;;  %v120_v40 = vrot.slane %v44_v21, %v119_v39  ;;  %v597_v48 = vld [vmem:[#allocation5 + $0x90] sm:$0xff]   ;;  %v230_v51 = vrot.slane %v44_v21, %v229_v50  ;;  %p647_p0 = pnand %p646_p13, %p640_p10 }
  0x23   :  { %529 = vmatprep.subr.bf16.mxu0 %v669_v0  ;;  %v598_v49 = vld [vmem:[#allocation5 + $0x88] sm:$0xff]   ;;  %v340_v60 = vrot.slane %v44_v21, %v339_v59 }
  0x25   :  { %512 = vmatpush3.bf16.msra.mxu1 %v577_v6 }
  0x26   :  { %513 = vmatprep.subr.bf16.mxu1 %v669_v0  ;;  %530 = vmatpush3.bf16.msra.mxu0 %v584_v13 }
  0x27   :  { %531 = vmatprep.subr.bf16.mxu0 %v669_v0 }
  0x29   :  { %514 = vmatpush3.bf16.msra.mxu1 %v578_v7 }
  0x2a   :  { %515 = vmatprep.subr.bf16.mxu1 %v669_v0  ;;  %532 = vmatpush3.bf16.msra.mxu0 %v585_v14 }
  0x2b   :  { %533 = vmatprep.subr.bf16.mxu0 %v669_v0 }
  0x2d   :  { %516 = vmatpush3.bf16.msra.mxu1 %v579_v8 }
  0x2e   :  { %517 = vmatprep.subr.bf16.mxu1 %v669_v0  ;;  %534 = vmatpush3.bf16.msra.mxu0 %v586_v15 }
  0x2f   :  { %535 = vmatprep.subr.bf16.mxu0 %v669_v0 }
  0x31   :  { %518 = vmatpush3.bf16.msra.mxu1 %v580_v9 }
  0x32   :  { %519 = vmatprep.subr.bf16.mxu1 %v669_v0  ;;  %536 = vmatpush3.bf16.msra.mxu0 %v587_v16 }
  0x33   :  { %537 = vmatprep.subr.bf16.mxu0 %v669_v0 }
  0x35   :  { %520 = vmatpush3.bf16.msra.mxu1 %v581_v10 }
  0x36   :  { %521 = vmatprep.subr.bf16.mxu1 %v669_v0  ;;  %538 = vmatpush3.bf16.msra.mxu0 %v588_v17 }
  0x37   :  { %539 = vmatprep.subr.bf16.mxu0 %v669_v0 }
  0x39   :  { %522 = vmatpush3.bf16.msra.mxu1 %v582_v11 }
  0x3a   :  { %547 = vmatprep.subr.bf16.mxu1 %v669_v0  ;;  %540 = vmatpush3.bf16.msra.mxu0 %v589_v31 }
  0x3b   :  { %541 = vmatprep.subr.bf16.mxu0 %v669_v0 }
  0x3e   :  { %542 = vmatpush3.bf16.msra.mxu0 %v590_v32 }
  0xe0   :  { %v93_v24 = vpop.f32.mrf.mxu0 }
  0xe1   :  { %v94_v25 = vadd.f32 %v93_v24, %v48_v23 }
  0xe2   :  { %v505_v26 = vpop.f32.mrf.mxu0 }
  0xe3   :  { %v99_v27 = vmax.f32 %v94_v25, 0.0 }
  0xe4   :  { %v96_v28 = vpop.f32.mrf.mxu0 }
  0xe5   :  { %v100_v29 = vpack.c.bf16 %v99_v27, %v99_v27 }
  0xe6   :  { %v506_v30 = vpop.f32.mrf.mxu0 }
  0xe7   :  { %524 = vmatmul.mubr.bf16.vlgmr.msra.gmra.mxu1 %v100_v29 }
  0xe8   :  { %563 = vmatprep.mubr.msk.bf16.mxu1 %vm670_vm0, %v669_v0  ;;  %548 = vmatpush3.bf16.msra.mxu1 %v591_v33 }
  0xe9   :  { %549 = vmatprep.subr.bf16.mxu1 %v669_v0 }
  0xec   :  { %550 = vmatpush3.bf16.msra.mxu1 %v592_v34 }
  0xed   :  { %551 = vmatprep.subr.bf16.mxu1 %v669_v0 }
  0xf0   :  { %552 = vmatpush3.bf16.msra.mxu1 %v593_v35 }
  0xf1   :  { %553 = vmatprep.subr.bf16.mxu1 %v669_v0 }
  0xf4   :  { %554 = vmatpush3.bf16.msra.mxu1 %v594_v36 }
  0xf5   :  { %555 = vmatprep.subr.bf16.mxu1 %v669_v0 }
  0xf8   :  { %556 = vmatpush3.bf16.msra.mxu1 %v595_v37 }
  0xf9   :  { %557 = vmatprep.subr.bf16.mxu1 %v669_v0 }
  0xfc   :  { %558 = vmatpush3.bf16.msra.mxu1 %v596_v38 }
  0xfd   :  { %559 = vmatprep.subr.bf16.mxu1 %v669_v0 }
 0x100   :  { %560 = vmatpush3.bf16.msra.mxu1 %v597_v48 }
 0x101   :  { %561 = vmatprep.subr.bf16.mxu1 %v669_v0 }
 0x104   :  { %562 = vmatpush3.bf16.msra.mxu1 %v598_v49 }
 0x1a7   :  { %v203_v41 = vpop.f32.mrf.mxu1 }
 0x1a8   :  { %v204_v42 = vadd.f32 %v203_v41, %v120_v40 }
 0x1a9   :  { %v525_v43 = vpop.f32.mrf.mxu1 }
 0x1aa   :  { %v209_v44 = vmax.f32 %v204_v42, 0.0 }
 0x1ab   :  { %v206_v45 = vpop.f32.mrf.mxu1 }
 0x1ac   :  { %v210_v46 = vpack.c.bf16 %v209_v44, %v209_v44 }
 0x1ad   :  { %v526_v47 = vpop.f32.mrf.mxu1 }
 0x1ae   :  { %544 = vmatmul.mubr.bf16.vlgmr.msra.gmra.mxu0 %v210_v46 }
 0x26e   :  { %v313_v52 = vpop.f32.mrf.mxu0 }
 0x26f   :  { %v314_v53 = vadd.f32 %v313_v52, %v230_v51 }
 0x270   :  { %v545_v54 = vpop.f32.mrf.mxu0 }
 0x271   :  { %v319_v55 = vmax.f32 %v314_v53, 0.0 }
 0x272   :  { %v316_v56 = vpop.f32.mrf.mxu0 }
 0x273   :  { %v320_v57 = vpack.c.bf16 %v319_v55, %v319_v55 }
 0x274   :  { %v546_v58 = vpop.f32.mrf.mxu0 }
 0x275   :  { %564 = vmatmul.mubr.bf16.vlgmr.msra.gmra.mxu1 %v320_v57 }
 0x335   :  { %v423_v61 = vpop.f32.mrf.mxu1 }
 0x336   :  { %v424_v62 = vadd.f32 %v423_v61, %v340_v60 }
 0x337   :  { %v565_v63 = vpop.f32.mrf.mxu1 }
 0x338   :  { %429 = vst [vmem:[#allocation7] sm:$0xff] %v424_v62 }
 0x339   :  { %v426_v0 = vpop.f32.mrf.mxu1 }
 0x33a   :  { %650 = shalt.err (!%p647_p0)
}
 0x33b   :  { %439 = dma.vmem_to_hbm [thread:$0]  %s437_s1, 128, %s737_s2, [#allocation4]   ;;  %v566_v1 = vpop.f32.mrf.mxu1 }
 0x33c   :  { %663 = dma.done.wait [#allocation4], 128  }
 0x33d   :  { %664 = vsyncadd [#allocation4], 4294967168 }
 0x33e   :  { %443 = vsyncpa [#allocation3], 1 }
 0x33f   :  { %444 = vsyncpa [#allocation6], 1 }
 0x340   :  { %445 = vsyncpa [#allocation4], 1 }

</bundles_post_ra>
